<compile_context>
chip_gen: v5e
topology: v5e:2x2
jax: 0.10.0
libtpu: 0.0.40
codegen_flags: <defaults>
</compile_context>

<pallas_src>
import jax
import jax.numpy as jnp
from jax.experimental import pallas as pl
from jax.experimental.pallas import tpu as pltpu


def _round_up(n, m):
    return ((n + m - 1) // m) * m


def _affine_kernel(x_ref, w_ref, b_ref, o_ref):
    # x_ref: (tb, D_in) f32 | w_ref: (1, D_in) bf16 | b_ref: (1, 1) f32
    # o_ref: (1, 1, tb)  -- lane-dense output row for this batch tile.
    xb = x_ref[...].astype(jnp.bfloat16)          # cast in VMEM, not in HBM
    # NT dot (contract both minor dims, like q @ k.T): (1,D)x(tb,D) -> (1,tb)
    o = jax.lax.dot_general(
        w_ref[...], xb,
        dimension_numbers=(((1,), (1,)), ((), ())),
        preferred_element_type=jnp.float32)
    o = o + b_ref[...]                            # f32 bias add (broadcast)
    o_ref[...] = o.astype(o_ref.dtype).reshape(o_ref.shape)


def fold_params(params):
    """Collapse the eval-mode network (all dropouts identity) into one affine
    map y = x @ w_full + b_full.  Exact fold in f32.  Call ONCE per model."""
    (w0, b0), *rest = params
    w_full = w0.astype(jnp.float32)               # (D_in, 1024) -> ... -> (D_in, 1)
    b_full = b0.astype(jnp.float32)
    for w, b in rest:
        w_full = w_full @ w
        b_full = b_full @ w + b
    return dict(
        w=w_full.T.astype(jnp.bfloat16),          # (1, D_in) lane-major row
        b=b_full.reshape(1, 1).astype(jnp.float32),
    )


def mlp_forward(x, folded, *, block_b=512):
    """x: (B, D_in).  folded: output of fold_params (hoisted out of the call)."""
    B, D_in = x.shape
    w, b = folded["w"], folded["b"]

    # Batch tile: multiple of 128, no bigger than the (rounded-up) batch, and
    # capped so batches >= 256 rows yield >= 2 grid steps (both v7x TCs work).
    tb = max(128, (block_b // 128) * 128)
    tb = min(tb, _round_up(B, 128))
    if B >= 2 * 128:
        tb = min(tb, _round_up(pl.cdiv(B, 2), 128))
    num_tiles = pl.cdiv(B, tb)

    out = pl.pallas_call(
        _affine_kernel,
        out_shape=jax.ShapeDtypeStruct((num_tiles, 1, tb), x.dtype),
        grid=(num_tiles,),
        in_specs=[
            pl.BlockSpec((tb, D_in), lambda i: (i, 0)),   # x tile (partial tail OK)
            pl.BlockSpec((1, D_in), lambda i: (0, 0)),    # folded weight (resident)
            pl.BlockSpec((1, 1), lambda i: (0, 0)),       # folded bias
        ],
        out_specs=pl.BlockSpec((1, 1, tb), lambda i: (i, 0, 0)),
        compiler_params=pltpu.CompilerParams(
            dimension_semantics=("parallel",)),
    )(x, w, b)
    # (num_tiles, 1, tb) -> (num_tiles*tb, 1); garbage rows past B are dropped.
    return out.reshape(num_tiles * tb, 1)[:B]


def init_params(key, input_size):
    """Deterministic init mimicking torch.nn.Linear default U[-1/sqrt(fan_in), +]."""
    dims = [input_size, 1024, 128, 64, 16, 1]
    params = []
    for i in range(len(dims) - 1):
        fan_in, fan_out = dims[i], dims[i + 1]
        key, kw, kb = jax.random.split(key, 3)
        bound = 1.0 / (fan_in ** 0.5)
        w = jax.random.uniform(kw, (fan_in, fan_out), jnp.float32, -bound, bound)
        b = jax.random.uniform(kb, (fan_out,), jnp.float32, -bound, bound)
        params.append((w, b))
    return params


if __name__ == "__main__":
    key = jax.random.PRNGKey(0)
    key, kx = jax.random.split(key)

    batch = 10          # deliberately NOT a multiple of the batch tile
    input_size = 768    # CLIP-L embedding dim used by the real aesthetic scorer

    x = jax.random.normal(kx, (batch, input_size), jnp.float32)
    params = init_params(key, input_size)

    # Hoisted: fold + bf16 cast happen once per model, not per forward call.
    folded = fold_params(params)

    out = jax.block_until_ready(mlp_forward(x, folded, block_b=512))
    assert out.shape == (batch, 1)

    # Pure-JAX f32 reference (eval-mode dropout == identity).
    ref = x
    for (w, b) in params:
        ref = ref @ w + b

    # bf16 MXU operands -> slightly relaxed tolerance vs the f32 reference.
    max_err = float(jnp.max(jnp.abs(out - ref)))
    assert jnp.allclose(out, ref, atol=5e-2, rtol=5e-2), max_err

    print("KERNEL_OK")
</pallas_src>

<mosaic_0001>
module attributes {stable_mosaic.version = 11 : i64} {
  func.func @_affine_kernel(%arg0: i32, %arg1: memref<128x768xf32, #tpu.memory_space<vmem>>, %arg2: memref<1x768xbf16, #tpu.memory_space<vmem>>, %arg3: memref<1x1xf32, #tpu.memory_space<vmem>>, %arg4: memref<1x1x128xf32, #tpu.memory_space<vmem>>) attributes {dimension_semantics = [#tpu.dimension_semantics<parallel>], iteration_bounds = array<i64: 1>, scalar_prefetch = 0 : i64, scratch_operands = 0 : i64, tpu.core_type = #tpu.core_type<tc>, window_params = [{transform_indices = @transform_0, window_bounds = array<i64: 128, 768>}, {pipeline_mode = #tpu.pipeline_mode<synchronous>, transform_indices = @transform_1, window_bounds = array<i64: 1, 768>}, {pipeline_mode = #tpu.pipeline_mode<synchronous>, transform_indices = @transform_2, window_bounds = array<i64: 1, 1>}, {transform_indices = @transform_3, window_bounds = array<i64: 1, 1, 128>}]} {
    %c0 = arith.constant 0 : index
    %c0_0 = arith.constant 0 : index
    %0 = vector.load %arg1[%c0, %c0_0] : memref<128x768xf32, #tpu.memory_space<vmem>>, vector<128x768xf32>
    %1 = arith.truncf %0 : vector<128x768xf32> to vector<128x768xbf16>
    %c0_1 = arith.constant 0 : index
    %c0_2 = arith.constant 0 : index
    %2 = vector.load %arg2[%c0_1, %c0_2] : memref<1x768xbf16, #tpu.memory_space<vmem>>, vector<1x768xbf16>
    %cst = arith.constant dense<0.000000e+00> : vector<1x128xf32>
    %3 = tpu.matmul %2, %1, %cst {dimension_numbers = #tpu.dot_dimension_numbers<[1], [1], [0], [0], [0, 0, 1, 0], [], []>} : vector<1x768xbf16>, vector<128x768xbf16>, vector<1x128xf32> -> vector<1x128xf32>
    %c0_3 = arith.constant 0 : index
    %c0_4 = arith.constant 0 : index
    %4 = vector.load %arg3[%c0_3, %c0_4] : memref<1x1xf32, #tpu.memory_space<vmem>>, vector<1x1xf32>
    %5 = vector.broadcast %4 : vector<1x1xf32> to vector<1x128xf32>
    %6 = arith.addf %3, %5 : vector<1x128xf32>
    %7 = vector.shape_cast %6 : vector<1x128xf32> to vector<1x1x128xf32>
    %c0_5 = arith.constant 0 : index
    %c0_6 = arith.constant 0 : index
    %c0_7 = arith.constant 0 : index
    %8 = vector.load %arg4[%c0_5, %c0_6, %c0_7] : memref<1x1x128xf32, #tpu.memory_space<vmem>>, vector<1x1x128xf32>
    tpu.vector_store %arg4[%c0_5, %c0_6, %c0_7], %7 {strides = array<i32>} : memref<1x1x128xf32, #tpu.memory_space<vmem>>, vector<1x1x128xf32>,
    return
  }
  func.func @transform_0(%arg0: i32) -> (i32, i32) {
    %c0_i32 = arith.constant 0 : i32
    %c0_i32_0 = arith.constant 0 : i32
    return %arg0, %c0_i32 : i32, i32
  }
  func.func @transform_1(%arg0: i32) -> (i32, i32) {
    %c0_i32 = arith.constant 0 : i32
    %c0_i32_0 = arith.constant 0 : i32
    %c0_i32_1 = arith.constant 0 : i32
    return %c0_i32, %c0_i32_0 : i32, i32
  }
  func.func @transform_2(%arg0: i32) -> (i32, i32) {
    %c0_i32 = arith.constant 0 : i32
    %c0_i32_0 = arith.constant 0 : i32
    %c0_i32_1 = arith.constant 0 : i32
    return %c0_i32, %c0_i32_0 : i32, i32
  }
  func.func @transform_3(%arg0: i32) -> (i32, i32, i32) {
    %c0_i32 = arith.constant 0 : i32
    %c0_i32_0 = arith.constant 0 : i32
    %c0_i32_1 = arith.constant 0 : i32
    return %arg0, %c0_i32, %c0_i32_0 : i32, i32, i32
  }
}

</mosaic_0001>

<bundles_post_ra>
// kernel: tpu_custom_call.1
= control target key start
LH: loop header
LB: loop body
LE: loop exit
PB: predicated region body
PF: predicated region fallthrough
CT: control target
= control target key end

     0   :  { %s433_s0 = inlined_call_operand.hbm [shape: f32[10,768], index: 0, kind: input, shape index: {}]   ;;  %s434_s1 = inlined_call_operand.hbm [shape: bf16[1,768], index: 1, kind: input, shape index: {}]   ;;  %s435_s2 = inlined_call_operand.<no memory space> [shape: f32[1,1], index: 2, kind: input, shape index: {}]   ;;  %s436_s3 = inlined_call_operand.hbm [shape: f32[1,1,128], index: 3, kind: output, shape index: {}]  }
   0x1   :  { %v8_v0 = vstv %s435_s2 }
   0x2   :  { %9 = vst [vmem:[#allocation2] sm:$0x1] %v8_v0 }
   0x3   :  { %10 = vsyncpa [#allocation4], 0 }
   0x4   :  { %11 = vsyncpa [#allocation7], 0 }
   0x5   :  { %12 = vsyncpa [#allocation5], 0 }
   0x6   :  { %16 = vsyncadd [#allocation4], 10752  ;;  %s17_s16 = sshll.u32 %s433_s0, 4  ;;  %s395_s17 = smov [#allocation3]   ;;  %s18_s16 = int_to_ptr.hbm [resolvable:$true] %s17_s16 }
   0x7   :  { %s19_s18 = sshll.u32 %s395_s17, 4  ;;  %s31_s21 = sshll.u32 %s434_s1, 4  ;;  %s20_s18 = int_to_ptr.vmem [resolvable:$true] %s19_s18  ;;  %s32_s21 = int_to_ptr.hbm [resolvable:$true] %s31_s21 }
   0x8   :  { %s396_s22 = smov 768   ;;  %s397_s23 = smov 48  }
   0x9   :  { %25 = dma.hbm_to_vmem [thread:$0]  %s18_s16, 1536, %s20_s18, [#allocation4], %s396_s22, %s396_s22, %s397_s23  }
   0xa   :  { %s398_s2 = smov [#allocation6]  }
   0xb   :  { %s33_s24 = sshll.u32 %s398_s2, 4  ;;  %s34_s24 = int_to_ptr.vmem [resolvable:$true] %s33_s24 }
   0xc   :  { %36 = dma.hbm_to_vmem [thread:$0]  %s32_s21, 96, %s34_s24, [#allocation7]  }
   0xd   :  { %389 = dma.done.wait [#allocation4], 12288  }
   0xe   :  { %390 = vsyncadd [#allocation4], 4294955008 }
   0xf   :  { %391 = dma.done.wait [#allocation7], 96  }
  0x10   :  { %392 = vsyncadd [#allocation7], 4294967200  ;;  %v131_v1 = vld [vmem:[#allocation3 + $0x2a0] sm:$0xff]  ;;  %v137_v2 = vld [vmem:[#allocation3 + $0x2d0] sm:$0xff]  ;;  %s400_s0 = smov [#allocation8]   ;;  %s299_s27 = sshll.u32 %s436_s3, 4  ;;  %s300_s27 = int_to_ptr.hbm [resolvable:$true] %s299_s27 }
  0x11   :  { %v132_v3 = vld [vmem:[#allocation3 + $0x2a8] sm:$0xff]  ;;  %v185_v4 = vpack.c.bf16 %v137_v2, %v131_v1  ;;  %v138_v5 = vld [vmem:[#allocation3 + $0x2d8] sm:$0xff]  ;;  %v119_v7 = vld [vmem:[#allocation3 + $0x240] sm:$0xff]  ;;  %s297_s1 = sshll.u32 %s400_s0, 4  ;;  %s298_s1 = int_to_ptr.vmem [resolvable:$true] %s297_s1 }
  0x12   :  { %v186_v6 = vpack.c.bf16 %v138_v5, %v132_v3  ;;  %v125_v8 = vld [vmem:[#allocation3 + $0x270] sm:$0xff]  ;;  %v120_v9 = vld [vmem:[#allocation3 + $0x248] sm:$0xff]  ;;  %v126_v10 = vld [vmem:[#allocation3 + $0x278] sm:$0xff] }
  0x13   :  { %213 = vmatpush.bf16.xpose.msra.mxu0 %v185_v4  ;;  %v133_v11 = vld [vmem:[#allocation3 + $0x2b0] sm:$0xff]  ;;  %v179_v12 = vpack.c.bf16 %v125_v8, %v119_v7  ;;  %v139_v13 = vld [vmem:[#allocation3 + $0x2e0] sm:$0xff]  ;;  %v134_v14 = vld [vmem:[#allocation3 + $0x2b8] sm:$0xff]  ;;  %v180_v16 = vpack.c.bf16 %v126_v10, %v120_v9 }
  0x14   :  { %226 = vmatpush.bf16.xpose.msra.mxu1 %v186_v6  ;;  %v140_v15 = vld [vmem:[#allocation3 + $0x2e8] sm:$0xff]  ;;  %v187_v17 = vpack.c.bf16 %v139_v13, %v133_v11  ;;  %v107_v19 = vld [vmem:[#allocation3 + $0x1e0] sm:$0xff]  ;;  %v113_v20 = vld [vmem:[#allocation3 + $0x210] sm:$0xff] }
  0x15   :  { %v188_v18 = vpack.c.bf16 %v140_v15, %v134_v14  ;;  %v121_v21 = vld [vmem:[#allocation3 + $0x250] sm:$0xff]  ;;  %v127_v22 = vld [vmem:[#allocation3 + $0x280] sm:$0xff]  ;;  %v122_v23 = vld [vmem:[#allocation3 + $0x258] sm:$0xff]  ;;  %v173_v29 = vpack.c.bf16 %v113_v20, %v107_v19 }
  0x16   :  { %239 = vmatpush.bf16.xpose.msra.mxu2 %v187_v17  ;;  %v108_v24 = vld [vmem:[#allocation3 + $0x1e8] sm:$0xff]  ;;  %v114_v25 = vld [vmem:[#allocation3 + $0x218] sm:$0xff]  ;;  %v181_v27 = vpack.c.bf16 %v127_v22, %v121_v21  ;;  %v95_v31 = vld [vmem:[#allocation3 + $0x180] sm:$0xff] }
  0x17   :  { %252 = vmatpush.bf16.xpose.msra.mxu3 %v188_v18  ;;  %v128_v26 = vld [vmem:[#allocation3 + $0x288] sm:$0xff]  ;;  %v174_v30 = vpack.c.bf16 %v114_v25, %v108_v24  ;;  %v101_v32 = vld [vmem:[#allocation3 + $0x1b0] sm:$0xff]  ;;  %v115_v34 = vld [vmem:[#allocation3 + $0x220] sm:$0xff] }
  0x18   :  { %v182_v28 = vpack.c.bf16 %v128_v26, %v122_v23  ;;  %v109_v33 = vld [vmem:[#allocation3 + $0x1f0] sm:$0xff]  ;;  %v110_v35 = vld [vmem:[#allocation3 + $0x1f8] sm:$0xff]  ;;  %v96_v36 = vld [vmem:[#allocation3 + $0x188] sm:$0xff]  ;;  %v167_v41 = vpack.c.bf16 %v101_v32, %v95_v31 }
  0x19   :  { %v102_v37 = vld [vmem:[#allocation3 + $0x1b8] sm:$0xff]  ;;  %v116_v38 = vld [vmem:[#allocation3 + $0x228] sm:$0xff]  ;;  %v175_v39 = vpack.c.bf16 %v115_v34, %v109_v33  ;;  %v83_v43 = vld [vmem:[#allocation3 + $0x120] sm:$0xff] }
  0x1a   :  { %v176_v40 = vpack.c.bf16 %v116_v38, %v110_v35  ;;  %v168_v42 = vpack.c.bf16 %v102_v37, %v96_v36  ;;  %v89_v44 = vld [vmem:[#allocation3 + $0x150] sm:$0xff]  ;;  %v84_v45 = vld [vmem:[#allocation3 + $0x128] sm:$0xff]  ;;  %v90_v46 = vld [vmem:[#allocation3 + $0x158] sm:$0xff] }
  0x1b   :  { %214 = vmatpush.bf16.xpose.msra.mxu0 %v179_v12  ;;  %v97_v47 = vld [vmem:[#allocation3 + $0x190] sm:$0xff]  ;;  %v103_v48 = vld [vmem:[#allocation3 + $0x1c0] sm:$0xff]  ;;  %v98_v49 = vld [vmem:[#allocation3 + $0x198] sm:$0xff]  ;;  %v161_v52 = vpack.c.bf16 %v89_v44, %v83_v43  ;;  %v162_v54 = vpack.c.bf16 %v90_v46, %v84_v45 }
  0x1c   :  { %227 = vmatpush.bf16.xpose.msra.mxu1 %v180_v16  ;;  %v169_v50 = vpack.c.bf16 %v103_v48, %v97_v47  ;;  %v104_v51 = vld [vmem:[#allocation3 + $0x1c8] sm:$0xff]  ;;  %v71_v55 = vld [vmem:[#allocation3 + $0xc0] sm:$0xff]  ;;  %v77_v56 = vld [vmem:[#allocation3 + $0xf0] sm:$0xff] }
  0x1d   :  { %v170_v53 = vpack.c.bf16 %v104_v51, %v98_v49  ;;  %v72_v57 = vld [vmem:[#allocation3 + $0xc8] sm:$0xff]  ;;  %v78_v58 = vld [vmem:[#allocation3 + $0xf8] sm:$0xff]  ;;  %v85_v59 = vld [vmem:[#allocation3 + $0x130] sm:$0xff]  ;;  %v155_v0 = vpack.c.bf16 %v77_v56, %v71_v55 }
  0x1e   :  { %240 = vmatpush.bf16.xpose.msra.mxu2 %v181_v27  ;;  %v91_v60 = vld [vmem:[#allocation3 + $0x160] sm:$0xff]  ;;  %v86_v61 = vld [vmem:[#allocation3 + $0x138] sm:$0xff]  ;;  %v92_v63 = vld [vmem:[#allocation3 + $0x168] sm:$0xff]  ;;  %v156_v2 = vpack.c.bf16 %v78_v58, %v72_v57 }
  0x1f   :  { %253 = vmatpush.bf16.xpose.msra.mxu3 %v182_v28  ;;  %v163_v62 = vpack.c.bf16 %v91_v60, %v85_v59  ;;  %v164_v1 = vpack.c.bf16 %v92_v63, %v86_v61  ;;  %v59_v3 = vld [vmem:[#allocation3 + $0x60] sm:$0xff]  ;;  %v65_v4 = vld [vmem:[#allocation3 + $0x90] sm:$0xff]  ;;  %v60_v5 = vld [vmem:[#allocation3 + $0x68] sm:$0xff]  ;;  %v399_v61 = vmov 0  }
  0x20   :  { %v66_v6 = vld [vmem:[#allocation3 + $0x98] sm:$0xff]  ;;  %v73_v7 = vld [vmem:[#allocation3 + $0xd0] sm:$0xff]  ;;  %v79_v8 = vld [vmem:[#allocation3 + $0x100] sm:$0xff]  ;;  %v149_v12 = vpack.c.bf16 %v65_v4, %v59_v3  ;;  %316 = vset.pattern.permute.xlu0 %v399_v61 }
  0x21   :  { %v74_v9 = vld [vmem:[#allocation3 + $0xd8] sm:$0xff]  ;;  %v157_v10 = vpack.c.bf16 %v79_v8, %v73_v7  ;;  %v80_v11 = vld [vmem:[#allocation3 + $0x108] sm:$0xff]  ;;  %v150_v14 = vpack.c.bf16 %v66_v6, %v60_v5  ;;  %v47_v15 = vld [vmem:[#allocation3] sm:$0xff] }
  0x22   :  { %v158_v13 = vpack.c.bf16 %v80_v11, %v74_v9  ;;  %v53_v16 = vld [vmem:[#allocation3 + $0x30] sm:$0xff]  ;;  %v48_v17 = vld [vmem:[#allocation3 + $0x8] sm:$0xff]  ;;  %v54_v18 = vld [vmem:[#allocation3 + $0x38] sm:$0xff] }
  0x23   :  { %215 = vmatpush.bf16.xpose.msra.mxu0 %v173_v29  ;;  %v135_v19 = vld [vmem:[#allocation3 + $0x2c0] sm:$0xff]  ;;  %v141_v20 = vld [vmem:[#allocation3 + $0x2f0] sm:$0xff]  ;;  %v62_v23 = vld [vmem:[#allocation3 + $0x78] sm:$0xff]  ;;  %v143_v28 = vpack.c.bf16 %v53_v16, %v47_v15 }
  0x24   :  { %228 = vmatpush.bf16.xpose.msra.mxu1 %v174_v30  ;;  %v61_v21 = vld [vmem:[#allocation3 + $0x70] sm:$0xff]  ;;  %v67_v22 = vld [vmem:[#allocation3 + $0xa0] sm:$0xff]  ;;  %v136_v24 = vld [vmem:[#allocation3 + $0x2c8] sm:$0xff]  ;;  %v144_v30 = vpack.c.bf16 %v54_v18, %v48_v17  ;;  %v189_v31 = vpack.c.bf16 %v141_v20, %v135_v19 }
  0x25   :  { %v142_v25 = vld [vmem:[#allocation3 + $0x2f8] sm:$0xff]  ;;  %v151_v26 = vpack.c.bf16 %v67_v22, %v61_v21  ;;  %v68_v27 = vld [vmem:[#allocation3 + $0xa8] sm:$0xff]  ;;  %v191_v33 = vld [vmem:[#allocation6] sm:$0x3f] }
  0x26   :  { %241 = vmatpush.bf16.xpose.msra.mxu2 %v175_v39  ;;  %v152_v29 = vpack.c.bf16 %v68_v27, %v62_v23  ;;  %v190_v32 = vpack.c.bf16 %v142_v25, %v136_v24  ;;  %v123_v34 = vld [vmem:[#allocation3 + $0x260] sm:$0xff]  ;;  %v129_v35 = vld [vmem:[#allocation3 + $0x290] sm:$0xff]  ;;  %200 = vst [vmem:[#allocation1] ss:$9 sm:$0xff] %v191_v33  ;;  %v50_v38 = vld [vmem:[#allocation3 + $0x18] sm:$0xff] }
  0x27   :  { %254 = vmatpush.bf16.xpose.msra.mxu3 %v176_v40  ;;  %v49_v36 = vld [vmem:[#allocation3 + $0x10] sm:$0xff]  ;;  %v55_v37 = vld [vmem:[#allocation3 + $0x40] sm:$0xff]  ;;  %v124_v39 = vld [vmem:[#allocation3 + $0x268] sm:$0xff]  ;;  %v183_v44 = vpack.c.bf16 %v129_v35, %v123_v34 }
  0x28   :  { %v130_v40 = vld [vmem:[#allocation3 + $0x298] sm:$0xff]  ;;  %v111_v48 = vld [vmem:[#allocation3 + $0x200] sm:$0xff]  ;;  %v117_v49 = vld [vmem:[#allocation3 + $0x230] sm:$0xff] }
  0x29   :  { %v184_v45 = vpack.c.bf16 %v130_v40, %v124_v39  ;;  %v118_v51 = vld [vmem:[#allocation3 + $0x238] sm:$0xff]  ;;  %v99_v56 = vld [vmem:[#allocation3 + $0x1a0] sm:$0xff]  ;;  %v105_v57 = vld [vmem:[#allocation3 + $0x1d0] sm:$0xff] }
  0x2a   :  { %v192_v58 = vld [vmem:[#allocation2] sm:$0x1]  ;;  %v100_v59 = vld [vmem:[#allocation3 + $0x1a8] sm:$0xff]  ;;  %v75_v6 = vld [vmem:[#allocation3 + $0xe0] sm:$0xff] }
  0x2b   :  { %216 = vmatpush.bf16.xpose.msra.mxu0 %v167_v41  ;;  %v145_v41 = vpack.c.bf16 %v55_v37, %v49_v36  ;;  %v106_v60 = vld [vmem:[#allocation3 + $0x1d8] sm:$0xff]  ;;  %195 = vperm.xlu0 %316, %v192_v58   ;;  %v81_v7 = vld [vmem:[#allocation3 + $0x110] sm:$0xff]  ;;  %v76_v8 = vld [vmem:[#allocation3 + $0xe8] sm:$0xff] }
  0x2c   :  { %229 = vmatpush.bf16.xpose.msra.mxu1 %v168_v42  ;;  %v56_v42 = vld [vmem:[#allocation3 + $0x48] sm:$0xff]  ;;  %v172_v63 = vpack.c.bf16 %v106_v60, %v100_v59  ;;  %v94_v3 = vld [vmem:[#allocation3 + $0x178] sm:$0xff]  ;;  %v51_v18 = vld [vmem:[#allocation3 + $0x20] sm:$0xff] }
  0x2d   :  { %v146_v43 = vpack.c.bf16 %v56_v42, %v50_v38  ;;  %v201_v46 = vld [vmem:[#allocation1] sm:$0xff]  ;;  %v202_v47 = vld [vmem:[#allocation1 + $0x9] sm:$0xff]  ;;  %v52_v20 = vld [vmem:[#allocation3 + $0x28] sm:$0xff] }
  0x2e   :  { %242 = vmatpush.bf16.xpose.msra.mxu2 %v169_v50  ;;  %v112_v50 = vld [vmem:[#allocation3 + $0x208] sm:$0xff]  ;;  %v82_v9 = vld [vmem:[#allocation3 + $0x118] sm:$0xff]  ;;  %v57_v19 = vld [vmem:[#allocation3 + $0x50] sm:$0xff] }
  0x2f   :  { %255 = vmatpush.bf16.xpose.msra.mxu3 %v170_v53  ;;  %v204_v53 = vld [vmem:[#allocation1 + $0x1b] sm:$0xff]  ;;  %v178_v55 = vpack.c.bf16 %v118_v51, %v112_v50  ;;  %v160_v11 = vpack.c.bf16 %v82_v9, %v76_v8  ;;  %v147_v22 = vpack.c.bf16 %v57_v19, %v51_v18  ;;  %v205_v24 = vld [vmem:[#allocation1 + $0x24] sm:$0xff]  ;;  %v206_v25 = vld [vmem:[#allocation1 + $0x2d] sm:$0xff] }
  0x30   :  { %v70_v15 = vld [vmem:[#allocation3 + $0xb8] sm:$0xff] }
  0x31   :  { %v58_v21 = vld [vmem:[#allocation3 + $0x58] sm:$0xff] }
  0x32   :  { %v148_v23 = vpack.c.bf16 %v58_v21, %v52_v20 }
  0x33   :  { %217 = vmatpush.bf16.xpose.msra.mxu0 %v161_v52  ;;  %v203_v52 = vld [vmem:[#allocation1 + $0x12] sm:$0xff] }
  0x34   :  { %230 = vmatpush.bf16.xpose.msra.mxu1 %v162_v54  ;;  %v177_v54 = vpack.c.bf16 %v117_v49, %v111_v48 }
  0x36   :  { %243 = vmatpush.bf16.xpose.msra.mxu2 %v163_v62  ;;  %v171_v62 = vpack.c.bf16 %v105_v57, %v99_v56 }
  0x37   :  { %256 = vmatpush.bf16.xpose.msra.mxu3 %v164_v1  ;;  %v93_v1 = vld [vmem:[#allocation3 + $0x170] sm:$0xff] }
  0x3b   :  { %218 = vmatpush.bf16.xpose.msra.mxu0 %v155_v0  ;;  %v87_v0 = vld [vmem:[#allocation3 + $0x140] sm:$0xff] }
  0x3c   :  { %231 = vmatpush.bf16.xpose.msra.mxu1 %v156_v2  ;;  %v88_v2 = vld [vmem:[#allocation3 + $0x148] sm:$0xff]  ;;  %v165_v4 = vpack.c.bf16 %v93_v1, %v87_v0 }
  0x3d   :  { %v166_v5 = vpack.c.bf16 %v94_v3, %v88_v2 }
  0x3e   :  { %244 = vmatpush.bf16.xpose.msra.mxu2 %v157_v10  ;;  %v159_v10 = vpack.c.bf16 %v81_v7, %v75_v6 }
  0x3f   :  { %257 = vmatpush.bf16.xpose.msra.mxu3 %v158_v13  ;;  %v69_v13 = vld [vmem:[#allocation3 + $0xb0] sm:$0xff] }
  0x43   :  { %219 = vmatpush.bf16.xpose.msra.mxu0 %v149_v12  ;;  %v63_v12 = vld [vmem:[#allocation3 + $0x80] sm:$0xff] }
  0x44   :  { %232 = vmatpush.bf16.xpose.msra.mxu1 %v150_v14  ;;  %v64_v14 = vld [vmem:[#allocation3 + $0x88] sm:$0xff]  ;;  %v153_v16 = vpack.c.bf16 %v69_v13, %v63_v12 }
  0x45   :  { %v154_v17 = vpack.c.bf16 %v70_v15, %v64_v14 }
  0x46   :  { %245 = vmatpush.bf16.xpose.msra.mxu2 %v151_v26 }
  0x47   :  { %258 = vmatpush.bf16.xpose.msra.mxu3 %v152_v29 }
  0x4b   :  { %220 = vmatpush.bf16.xpose.msra.mxu0 %v143_v28 }
  0x4c   :  { %233 = vmatpush.bf16.xpose.msra.mxu1 %v144_v30 }
  0x4e   :  { %246 = vmatpush.bf16.xpose.msra.mxu2 %v145_v41 }
  0x4f   :  { %259 = vmatpush.bf16.xpose.msra.mxu3 %v146_v43 }
  0x52   :  { %221 = vmatmul.bf16.vlgmr.msra.gmra.mxu0 %v201_v46 }
  0x53   :  { %265 = vmatpush.bf16.xpose.msrb.mxu0 %v189_v31  ;;  %234 = vmatmul.bf16.vlgmr.msra.gmra.mxu1 %v202_v47 }
  0x54   :  { %278 = vmatpush.bf16.xpose.msrb.mxu1 %v190_v32 }
  0x55   :  { %247 = vmatmul.bf16.vlgmr.msra.gmra.mxu2 %v203_v52 }
  0x56   :  { %260 = vmatmul.bf16.vlgmr.msra.gmra.mxu3 %v204_v53 }
  0x5b   :  { %266 = vmatpush.bf16.xpose.msrb.mxu0 %v183_v44 }
  0x5c   :  { %279 = vmatpush.bf16.xpose.msrb.mxu1 %v184_v45 }
  0x63   :  { %267 = vmatpush.bf16.xpose.msrb.mxu0 %v177_v54 }
  0x64   :  { %280 = vmatpush.bf16.xpose.msrb.mxu1 %v178_v55 }
  0x6b   :  { %268 = vmatpush.bf16.xpose.msrb.mxu0 %v171_v62 }
  0x6c   :  { %281 = vmatpush.bf16.xpose.msrb.mxu1 %v172_v63 }
  0x73   :  { %269 = vmatpush.bf16.xpose.msrb.mxu0 %v165_v4 }
  0x74   :  { %282 = vmatpush.bf16.xpose.msrb.mxu1 %v166_v5 }
  0x7b   :  { %270 = vmatpush.bf16.xpose.msrb.mxu0 %v159_v10 }
  0x7c   :  { %283 = vmatpush.bf16.xpose.msrb.mxu1 %v160_v11 }
  0x83   :  { %271 = vmatpush.bf16.xpose.msrb.mxu0 %v153_v16 }
  0x84   :  { %284 = vmatpush.bf16.xpose.msrb.mxu1 %v154_v17 }
  0x8b   :  { %272 = vmatpush.bf16.xpose.msrb.mxu0 %v147_v22 }
  0x8c   :  { %285 = vmatpush.bf16.xpose.msrb.mxu1 %v148_v23 }
  0x92   :  { %273 = vmatmul.bf16.vlgmr.msrb.gmra.mxu0 %v205_v24 }
  0x93   :  { %286 = vmatmul.bf16.vlgmr.msrb.gmra.mxu1 %v206_v25 }
  0x9d   :  { %v196_v34 = vpop.permute.xlu0 %195 }
  0x9e   :  { %v198_v35 = vperm.slane %v196_v34, 0 }
  0xcf   :  { %v222_v27 = vpop.f32.mrf.mxu0 }
  0xd0   :  { %v235_v26 = vpop.f32.mrf.mxu1  ;;  %v223_v36 = vadd.f32 %v222_v27, %v198_v35 }
  0xd2   :  { %v236_v37 = vadd.f32 %v235_v26, %v223_v36 }
  0xd7   :  { %v224_v29 = vpop.f32.mrf.mxu0 }
  0xd8   :  { %v237_v28 = vpop.f32.mrf.mxu1  ;;  %v248_v30 = vpop.f32.mrf.mxu2 }
  0xd9   :  { %v261_v31 = vpop.f32.mrf.mxu3  ;;  %v249_v38 = vadd.f32 %v248_v30, %v236_v37 }
  0xdb   :  { %v262_v39 = vadd.f32 %v261_v31, %v249_v38 }
  0xe0   :  { %v250_v32 = vpop.f32.mrf.mxu2 }
  0xe1   :  { %v263_v33 = vpop.f32.mrf.mxu3 }
 0x10f   :  { %v274_v40 = vpop.f32.mrf.mxu0 }
 0x110   :  { %v275_v41 = vadd.f32 %v274_v40, %v262_v39  ;;  %v287_v42 = vpop.f32.mrf.mxu1 }
 0x112   :  { %v288_v43 = vadd.f32 %v287_v42, %v275_v41 }
 0x114   :  { %291 = vst [vmem:[#allocation8] sm:$0x1] %v288_v43 }
 0x115   :  { %302 = dma.vmem_to_hbm [thread:$0]  %s298_s1, 16, %s300_s27, [#allocation5]  }
 0x117   :  { %v276_v44 = vpop.f32.mrf.mxu0 }
 0x118   :  { %v289_v45 = vpop.f32.mrf.mxu1 }
 0x119   :  { %393 = dma.done.wait [#allocation5], 16  }
 0x11a   :  { %394 = vsyncadd [#allocation5], 4294967280 }
 0x11b   :  { %307 = vsyncpa [#allocation4], 1 }
 0x11c   :  { %308 = vsyncpa [#allocation7], 1 }
 0x11d   :  { %309 = vsyncpa [#allocation5], 1 }

</bundles_post_ra>
